<compile_context>
chip_gen: v7x
topology: tpu7x:2x2x1
jax: 0.10.0
libtpu: 0.0.40
codegen_flags: <defaults>
</compile_context>

<pallas_src>
import jax
import jax.numpy as jnp
from jax.experimental import pallas as pl
from jax.experimental.pallas import tpu as pltpu  # noqa: F401  (kept for TPU-specific tuning)


# --------------------------------- kernel ------------------------------------

def sentinel_lstm3_kernel(x_ref, h_ref, c_ref,
                          wx_ref, wh_ref, b_ref,
                          wf1_ref, wf2_ref,
                          out_ref):
    f32 = jnp.float32
    H = wf1_ref.shape[0]

    x = x_ref[...]          # (B, 2H)
    h_flat = h_ref[...]     # (B, 3H)  = [h_prev0 | h_prev1 | h_prev2]
    c_flat = c_ref[...]     # (B, 3H)  = [c_prev0 | c_prev1 | c_prev2]

    # Upfront, input-only gate contributions for all three cells + sentinel gate.
    # Two independent dots (so no per-call concat of x and h is needed); both are
    # off the serial h0->h1->h2 dependency chain.
    pre = (jnp.dot(x, wx_ref[...], preferred_element_type=f32)
           + jnp.dot(h_flat, wh_ref[...], preferred_element_type=f32)
           + b_ref[...])                                            # (B, 13H)

    def apply_cell(gates, c_prev):
        # gates: (B, 4H) or (B, 5H). PyTorch gate order: i, f, g, o [, sentinel].
        sig = jax.nn.sigmoid(gates)          # one full-width EUP pass covers i,f,o(,sv)
        i = sig[:, 0 * H:1 * H]
        fg = sig[:, 1 * H:2 * H]
        o = sig[:, 3 * H:4 * H]
        g = jnp.tanh(gates[:, 2 * H:3 * H])
        c_new = fg * c_prev + i * g
        h_new = o * jnp.tanh(c_new)
        return h_new, c_new, sig

    # ---- cell 0: gates fully precomputed -------------------------------------
    h0, c0, _ = apply_cell(pre[:, 0:4 * H], c_flat[:, 0:H])

    # ---- cell 1: only the h0-dependent folded term stays on the chain --------
    g1 = pre[:, 4 * H:8 * H] + jnp.dot(h0, wf1_ref[...], preferred_element_type=f32)
    h1, c1, _ = apply_cell(g1, c_flat[:, H:2 * H])

    # ---- cell 2 + sentinel: h0 and h1 share the same folded weights ----------
    g2 = pre[:, 8 * H:13 * H] + jnp.dot(h0 + h1, wf2_ref[...],
                                        preferred_element_type=f32)
    h2, c2, sig2 = apply_cell(g2, c_flat[:, 2 * H:3 * H])
    s_t = sig2[:, 4 * H:5 * H] * jnp.tanh(c2)

    # ---- single lane-dense packed output: [h0|h1|h2|c0|c1|c2|s_t|pad] --------
    pad = jnp.zeros_like(s_t)
    out_ref[...] = jnp.concatenate([h0, h1, h2, c0, c1, c2, s_t, pad], axis=-1)


# --------------------------- one-time weight prep ----------------------------

def prepare_params(p):
    """Hoisted out of the per-step forward: build stacked / folded weights once."""
    H = p["whh0"].shape[0]
    D = p["wih0"].shape[0]
    assert D == 2 * H, "SentinelLSTM3 requires input_size == 2 * hidden_size"
    f32 = jnp.float32

    # Fuse sentinel x_gate / h_gate onto cell 2's gate weights: (D,5H)/(H,5H)/(1,5H).
    wih2e = jnp.concatenate([p["wih2"], p["wxg"]], axis=1)
    whh2e = jnp.concatenate([p["whh2"], p["whg"]], axis=1)
    b2e = jnp.concatenate([p["bih2"] + p["bhh2"], p["bxg"] + p["bhg"]], axis=1)

    # Wide upfront GEMM weights:  pre = x @ Wx + [h0|h1|h2] @ Wh + b   -> (B, 13H)
    wx = jnp.concatenate([p["wih0"], p["wih1"], wih2e], axis=1)          # (2H, 13H)
    z4 = jnp.zeros((H, 4 * H), f32)
    z5 = jnp.zeros((H, 5 * H), f32)
    wh = jnp.concatenate([
        jnp.concatenate([p["whh0"], z4, z5], axis=1),
        jnp.concatenate([z4, p["whh1"], z5], axis=1),
        jnp.concatenate([z4, z4, whh2e], axis=1),
    ], axis=0)                                                           # (3H, 13H)
    b = jnp.concatenate([p["bih0"] + p["bhh0"],
                         p["bih1"] + p["bhh1"],
                         b2e], axis=1)                                   # (1, 13H)

    # Folded residual weights: x_{l+1} = x_l + [h_l | h_l]
    #   => [h|h] @ W == h @ (W[:H] + W[H:])
    wf1 = p["wih1"][:H] + p["wih1"][H:]                                  # (H, 4H)
    wf2 = wih2e[:H] + wih2e[H:]                                          # (H, 5H)

    return {"wx": wx, "wh": wh, "b": b, "wf1": wf1, "wf2": wf2, "H": H, "D": D}


# --------------------------------- wrapper ------------------------------------

def sentinel_lstm3_pallas(x, h_tm1, c_tm1, pp):
    """x: (B, 2H) f32, h_tm1/c_tm1: (B, 3, H) f32, pp: prepare_params() output."""
    B, _ = x.shape
    H = pp["H"]

    # (B, 3, H) -> (B, 3H): contiguous row-major reshape (no transpose, no copy).
    h_flat = h_tm1.reshape(B, 3 * H)
    c_flat = c_tm1.reshape(B, 3 * H)

    out_w = 8 * H   # [h0|h1|h2|c0|c1|c2|s_t|pad]; = 256 lanes for H=32 (2 full vregs)
    packed = pl.pallas_call(
        sentinel_lstm3_kernel,
        out_shape=jax.ShapeDtypeStruct((B, out_w), jnp.float32),
    )(x, h_flat, c_flat, pp["wx"], pp["wh"], pp["b"], pp["wf1"], pp["wf2"])

    ht = packed[:, 0:3 * H].reshape(B, 3, H)       # stack([h0, h1, h_top], dim=1)
    ct = packed[:, 3 * H:6 * H].reshape(B, 3, H)   # stack([c0, c1, c2], dim=1)
    h_top = packed[:, 2 * H:3 * H]
    s_t = packed[:, 6 * H:7 * H]
    return ht, ct, h_top, s_t


# ----------------------------- pure-JAX reference -----------------------------

def _lstm_cell_ref(x, h, c, wih, whh, bih, bhh):
    H = whh.shape[0]
    gates = x @ wih + h @ whh + bih + bhh
    i = jax.nn.sigmoid(gates[:, 0 * H:1 * H])
    f_ = jax.nn.sigmoid(gates[:, 1 * H:2 * H])
    g = jnp.tanh(gates[:, 2 * H:3 * H])
    o = jax.nn.sigmoid(gates[:, 3 * H:4 * H])
    c_new = f_ * c + i * g
    return o * jnp.tanh(c_new), c_new


def sentinel_lstm3_ref(x, h_tm1, c_tm1, p):
    h0, c0 = _lstm_cell_ref(x, h_tm1[:, 0], c_tm1[:, 0],
                            p["wih0"], p["whh0"], p["bih0"], p["bhh0"])
    x = jnp.concatenate([h0, h0], axis=-1) + x
    h1, c1 = _lstm_cell_ref(x, h_tm1[:, 1], c_tm1[:, 1],
                            p["wih1"], p["whh1"], p["bih1"], p["bhh1"])
    x = jnp.concatenate([h1, h1], axis=-1) + x
    h_top, c2 = _lstm_cell_ref(x, h_tm1[:, 2], c_tm1[:, 2],
                               p["wih2"], p["whh2"], p["bih2"], p["bhh2"])
    sv = jax.nn.sigmoid(h_tm1[:, 2] @ p["whg"] + p["bhg"] + x @ p["wxg"] + p["bxg"])
    s_t = sv * jnp.tanh(c2)
    ht = jnp.stack([h0, h1, h_top], axis=1)
    ct = jnp.stack([c0, c1, c2], axis=1)
    return ht, ct, h_top, s_t


# ----------------------------- param construction -----------------------------

def make_lstm_cell_params(key, in_f, hid):
    """PyTorch nn.LSTMCell default init: U(-1/sqrt(hidden), 1/sqrt(hidden)); W as (in, 4H)."""
    k = 1.0 / float(hid) ** 0.5
    k1, k2, k3, k4 = jax.random.split(key, 4)
    wih = jax.random.uniform(k1, (in_f, 4 * hid), jnp.float32, -k, k)
    whh = jax.random.uniform(k2, (hid, 4 * hid), jnp.float32, -k, k)
    bih = jax.random.uniform(k3, (1, 4 * hid), jnp.float32, -k, k)
    bhh = jax.random.uniform(k4, (1, 4 * hid), jnp.float32, -k, k)
    return wih, whh, bih, bhh


def make_linear_params(key, in_f, out_f):
    """PyTorch nn.Linear default init: U(-1/sqrt(in), 1/sqrt(in)); W stored as (in, out)."""
    k = 1.0 / float(in_f) ** 0.5
    kw, kb = jax.random.split(key)
    w = jax.random.uniform(kw, (in_f, out_f), jnp.float32, -k, k)
    b = jax.random.uniform(kb, (1, out_f), jnp.float32, -k, k)
    return w, b


if __name__ == "__main__":
    H = 32            # hidden_size
    D = 2 * H         # input_size (h.repeat(1, 2) + x requires input_size == 2 * hidden_size)
    B = 8             # batch (fills all 8 sublanes in one grid step)

    root = jax.random.PRNGKey(0)
    keys = jax.random.split(root, 8)

    x = jax.random.normal(keys[0], (B, D), jnp.float32)
    h_tm1 = jax.random.normal(keys[1], (B, 3, H), jnp.float32)
    c_tm1 = jax.random.normal(keys[2], (B, 3, H), jnp.float32)

    p = {}
    p["wih0"], p["whh0"], p["bih0"], p["bhh0"] = make_lstm_cell_params(keys[3], D, H)
    p["wih1"], p["whh1"], p["bih1"], p["bhh1"] = make_lstm_cell_params(keys[4], D, H)
    p["wih2"], p["whh2"], p["bih2"], p["bhh2"] = make_lstm_cell_params(keys[5], D, H)
    p["wxg"], p["bxg"] = make_linear_params(keys[6], D, H)   # x_gate
    p["whg"], p["bhg"] = make_linear_params(keys[7], H, H)   # h_gate

    # One-time weight preparation (paid once, not per timestep).
    pp = jax.tree_util.tree_map(
        lambda a: a, prepare_params(p))
    jax.block_until_ready(pp)

    ht, ct, h_top, s_t = sentinel_lstm3_pallas(x, h_tm1, c_tm1, pp)
    jax.block_until_ready((ht, ct, h_top, s_t))

    ht_r, ct_r, h_top_r, s_t_r = sentinel_lstm3_ref(x, h_tm1, c_tm1, p)
    assert ht.shape == (B, 3, H) and ct.shape == (B, 3, H)
    assert h_top.shape == (B, H) and s_t.shape == (B, H)
    for got, ref, name in ((ht, ht_r, "ht"), (ct, ct_r, "ct"),
                           (h_top, h_top_r, "h_top"), (s_t, s_t_r, "s_t")):
        assert jnp.allclose(got, ref, atol=1e-4, rtol=1e-4), (
            f"{name}: max abs diff = {jnp.max(jnp.abs(got - ref))}")

    print("KERNEL_OK")
</pallas_src>

<mosaic_0001>
module attributes {stable_mosaic.version = 11 : i64} {
  func.func @sentinel_lstm3_kernel(%arg0: memref<8x64xf32, #tpu.memory_space<vmem>>, %arg1: memref<8x96xf32, #tpu.memory_space<vmem>>, %arg2: memref<8x96xf32, #tpu.memory_space<vmem>>, %arg3: memref<64x416xf32, #tpu.memory_space<vmem>>, %arg4: memref<96x416xf32, #tpu.memory_space<vmem>>, %arg5: memref<1x416xf32, #tpu.memory_space<vmem>>, %arg6: memref<32x128xf32, #tpu.memory_space<vmem>>, %arg7: memref<32x160xf32, #tpu.memory_space<vmem>>, %arg8: memref<8x256xf32, #tpu.memory_space<vmem>>) attributes {dimension_semantics = [], scalar_prefetch = 0 : i64, scratch_operands = 0 : i64, tpu.core_type = #tpu.core_type<tc>} {
    %c0 = arith.constant 0 : index
    %c0_0 = arith.constant 0 : index
    %0 = vector.load %arg0[%c0, %c0_0] : memref<8x64xf32, #tpu.memory_space<vmem>>, vector<8x64xf32>
    %c0_1 = arith.constant 0 : index
    %c0_2 = arith.constant 0 : index
    %1 = vector.load %arg1[%c0_1, %c0_2] : memref<8x96xf32, #tpu.memory_space<vmem>>, vector<8x96xf32>
    %c0_3 = arith.constant 0 : index
    %c0_4 = arith.constant 0 : index
    %2 = vector.load %arg2[%c0_3, %c0_4] : memref<8x96xf32, #tpu.memory_space<vmem>>, vector<8x96xf32>
    %c0_5 = arith.constant 0 : index
    %c0_6 = arith.constant 0 : index
    %3 = vector.load %arg3[%c0_5, %c0_6] : memref<64x416xf32, #tpu.memory_space<vmem>>, vector<64x416xf32>
    %cst = arith.constant dense<0.000000e+00> : vector<8x416xf32>
    %4 = tpu.matmul %0, %3, %cst {dimension_numbers = #tpu.dot_dimension_numbers<[1], [0], [0], [1], [0, 0, 1, 1], [], []>} : vector<8x64xf32>, vector<64x416xf32>, vector<8x416xf32> -> vector<8x416xf32>
    %c0_7 = arith.constant 0 : index
    %c0_8 = arith.constant 0 : index
    %5 = vector.load %arg4[%c0_7, %c0_8] : memref<96x416xf32, #tpu.memory_space<vmem>>, vector<96x416xf32>
    %cst_9 = arith.constant dense<0.000000e+00> : vector<8x416xf32>
    %6 = tpu.matmul %1, %5, %cst_9 {dimension_numbers = #tpu.dot_dimension_numbers<[1], [0], [0], [1], [0, 0, 1, 1], [], []>} : vector<8x96xf32>, vector<96x416xf32>, vector<8x416xf32> -> vector<8x416xf32>
    %7 = arith.addf %4, %6 : vector<8x416xf32>
    %c0_10 = arith.constant 0 : index
    %c0_11 = arith.constant 0 : index
    %8 = vector.load %arg5[%c0_10, %c0_11] : memref<1x416xf32, #tpu.memory_space<vmem>>, vector<1x416xf32>
    %9 = vector.broadcast %8 : vector<1x416xf32> to vector<8x416xf32>
    %10 = arith.addf %7, %9 : vector<8x416xf32>
    %11 = vector.extract_strided_slice %10 {offsets = [0, 0], sizes = [8, 128], strides = [1, 1]} : vector<8x416xf32> to vector<8x128xf32>
    %12 = vector.extract_strided_slice %2 {offsets = [0, 0], sizes = [8, 32], strides = [1, 1]} : vector<8x96xf32> to vector<8x32xf32>
    %13 = arith.negf %11 : vector<8x128xf32>
    %14 = math.exp %13 : vector<8x128xf32>
    %cst_12 = arith.constant 1.000000e+00 : f32
    %15 = vector.broadcast %cst_12 : f32 to vector<8x128xf32>
    %16 = arith.addf %15, %14 : vector<8x128xf32>
    %17 = arith.divf %15, %16 : vector<8x128xf32>
    %18 = vector.extract_strided_slice %17 {offsets = [0, 0], sizes = [8, 32], strides = [1, 1]} : vector<8x128xf32> to vector<8x32xf32>
    %19 = vector.extract_strided_slice %17 {offsets = [0, 32], sizes = [8, 32], strides = [1, 1]} : vector<8x128xf32> to vector<8x32xf32>
    %20 = vector.extract_strided_slice %17 {offsets = [0, 96], sizes = [8, 32], strides = [1, 1]} : vector<8x128xf32> to vector<8x32xf32>
    %21 = vector.extract_strided_slice %11 {offsets = [0, 64], sizes = [8, 32], strides = [1, 1]} : vector<8x128xf32> to vector<8x32xf32>
    %22 = math.tanh %21 : vector<8x32xf32>
    %23 = arith.mulf %19, %12 : vector<8x32xf32>
    %24 = arith.mulf %18, %22 : vector<8x32xf32>
    %25 = arith.addf %23, %24 : vector<8x32xf32>
    %26 = math.tanh %25 : vector<8x32xf32>
    %27 = arith.mulf %20, %26 : vector<8x32xf32>
    %28 = vector.extract_strided_slice %10 {offsets = [0, 128], sizes = [8, 128], strides = [1, 1]} : vector<8x416xf32> to vector<8x128xf32>
    %c0_13 = arith.constant 0 : index
    %c0_14 = arith.constant 0 : index
    %29 = vector.load %arg6[%c0_13, %c0_14] : memref<32x128xf32, #tpu.memory_space<vmem>>, vector<32x128xf32>
    %cst_15 = arith.constant dense<0.000000e+00> : vector<8x128xf32>
    %30 = tpu.matmul %27, %29, %cst_15 {dimension_numbers = #tpu.dot_dimension_numbers<[1], [0], [0], [1], [0, 0, 1, 1], [], []>} : vector<8x32xf32>, vector<32x128xf32>, vector<8x128xf32> -> vector<8x128xf32>
    %31 = arith.addf %28, %30 : vector<8x128xf32>
    %32 = vector.extract_strided_slice %2 {offsets = [0, 32], sizes = [8, 32], strides = [1, 1]} : vector<8x96xf32> to vector<8x32xf32>
    %33 = arith.negf %31 : vector<8x128xf32>
    %34 = math.exp %33 : vector<8x128xf32>
    %cst_16 = arith.constant 1.000000e+00 : f32
    %35 = vector.broadcast %cst_16 : f32 to vector<8x128xf32>
    %36 = arith.addf %35, %34 : vector<8x128xf32>
    %37 = arith.divf %35, %36 : vector<8x128xf32>
    %38 = vector.extract_strided_slice %37 {offsets = [0, 0], sizes = [8, 32], strides = [1, 1]} : vector<8x128xf32> to vector<8x32xf32>
    %39 = vector.extract_strided_slice %37 {offsets = [0, 32], sizes = [8, 32], strides = [1, 1]} : vector<8x128xf32> to vector<8x32xf32>
    %40 = vector.extract_strided_slice %37 {offsets = [0, 96], sizes = [8, 32], strides = [1, 1]} : vector<8x128xf32> to vector<8x32xf32>
    %41 = vector.extract_strided_slice %31 {offsets = [0, 64], sizes = [8, 32], strides = [1, 1]} : vector<8x128xf32> to vector<8x32xf32>
    %42 = math.tanh %41 : vector<8x32xf32>
    %43 = arith.mulf %39, %32 : vector<8x32xf32>
    %44 = arith.mulf %38, %42 : vector<8x32xf32>
    %45 = arith.addf %43, %44 : vector<8x32xf32>
    %46 = math.tanh %45 : vector<8x32xf32>
    %47 = arith.mulf %40, %46 : vector<8x32xf32>
    %48 = vector.extract_strided_slice %10 {offsets = [0, 256], sizes = [8, 160], strides = [1, 1]} : vector<8x416xf32> to vector<8x160xf32>
    %49 = arith.addf %27, %47 : vector<8x32xf32>
    %c0_17 = arith.constant 0 : index
    %c0_18 = arith.constant 0 : index
    %50 = vector.load %arg7[%c0_17, %c0_18] : memref<32x160xf32, #tpu.memory_space<vmem>>, vector<32x160xf32>
    %cst_19 = arith.constant dense<0.000000e+00> : vector<8x160xf32>
    %51 = tpu.matmul %49, %50, %cst_19 {dimension_numbers = #tpu.dot_dimension_numbers<[1], [0], [0], [1], [0, 0, 1, 1], [], []>} : vector<8x32xf32>, vector<32x160xf32>, vector<8x160xf32> -> vector<8x160xf32>
    %52 = arith.addf %48, %51 : vector<8x160xf32>
    %53 = vector.extract_strided_slice %2 {offsets = [0, 64], sizes = [8, 32], strides = [1, 1]} : vector<8x96xf32> to vector<8x32xf32>
    %54 = arith.negf %52 : vector<8x160xf32>
    %55 = math.exp %54 : vector<8x160xf32>
    %cst_20 = arith.constant 1.000000e+00 : f32
    %56 = vector.broadcast %cst_20 : f32 to vector<8x160xf32>
    %57 = arith.addf %56, %55 : vector<8x160xf32>
    %58 = arith.divf %56, %57 : vector<8x160xf32>
    %59 = vector.extract_strided_slice %58 {offsets = [0, 0], sizes = [8, 32], strides = [1, 1]} : vector<8x160xf32> to vector<8x32xf32>
    %60 = vector.extract_strided_slice %58 {offsets = [0, 32], sizes = [8, 32], strides = [1, 1]} : vector<8x160xf32> to vector<8x32xf32>
    %61 = vector.extract_strided_slice %58 {offsets = [0, 96], sizes = [8, 32], strides = [1, 1]} : vector<8x160xf32> to vector<8x32xf32>
    %62 = vector.extract_strided_slice %52 {offsets = [0, 64], sizes = [8, 32], strides = [1, 1]} : vector<8x160xf32> to vector<8x32xf32>
    %63 = math.tanh %62 : vector<8x32xf32>
    %64 = arith.mulf %60, %53 : vector<8x32xf32>
    %65 = arith.mulf %59, %63 : vector<8x32xf32>
    %66 = arith.addf %64, %65 : vector<8x32xf32>
    %67 = math.tanh %66 : vector<8x32xf32>
    %68 = arith.mulf %61, %67 : vector<8x32xf32>
    %69 = vector.extract_strided_slice %58 {offsets = [0, 128], sizes = [8, 32], strides = [1, 1]} : vector<8x160xf32> to vector<8x32xf32>
    %70 = math.tanh %66 : vector<8x32xf32>
    %71 = arith.mulf %69, %70 : vector<8x32xf32>
    %cst_21 = arith.constant 0.000000e+00 : f32
    %72 = vector.broadcast %cst_21 : f32 to vector<8x32xf32>
    %73 = tpu.concatenate %27, %47, %68, %25, %45, %66, %71, %72 in 1 : vector<8x32xf32>, vector<8x32xf32>, vector<8x32xf32>, vector<8x32xf32>, vector<8x32xf32>, vector<8x32xf32>, vector<8x32xf32>, vector<8x32xf32> -> vector<8x256xf32>
    %c0_22 = arith.constant 0 : index
    %c0_23 = arith.constant 0 : index
    %74 = vector.load %arg8[%c0_22, %c0_23] : memref<8x256xf32, #tpu.memory_space<vmem>>, vector<8x256xf32>
    tpu.vector_store %arg8[%c0_22, %c0_23], %73 {strides = array<i32>} : memref<8x256xf32, #tpu.memory_space<vmem>>, vector<8x256xf32>,
    return
  }
}

</mosaic_0001>

<bundles_post_ra>
// kernel: tpu_custom_call.1
= control target key start
LH: loop header
LB: loop body
LE: loop exit
PB: predicated region body
PF: predicated region fallthrough
CT: control target
= control target key end

     0   :  { %13 = vsyncpa [#allocation3], 0  ;;  %s1444_s0 = inlined_call_operand.hbm [shape: f32[8,64], index: 0, kind: input, shape index: {}]   ;;  %s1445_s1 = inlined_call_operand.hbm [shape: f32[8,96], index: 1, kind: input, shape index: {}]   ;;  %s1446_s2 = inlined_call_operand.hbm [shape: f32[8,96], index: 2, kind: input, shape index: {}]   ;;  %s1447_s3 = inlined_call_operand.hbm [shape: f32[64,416], index: 3, kind: input, shape index: {}]   ;;  %s1448_s4 = inlined_call_operand.hbm [shape: f32[96,416], index: 4, kind: input, shape index: {}]   ;;  %s1449_s5 = inlined_call_operand.vmem [shape: f32[1,416], index: 5, kind: input, shape index: {}]   ;;  %s1450_s6 = inlined_call_operand.hbm [shape: f32[32,128], index: 6, kind: input, shape index: {}]   ;;  %s1451_s7 = inlined_call_operand.hbm [shape: f32[32,160], index: 7, kind: input, shape index: {}]   ;;  %s1452_s8 = inlined_call_operand.hbm [shape: f32[8,256], index: 8, kind: output, shape index: {}]  }
   0x1   :  { %14 = vsyncpa [#allocation6], 0 }
   0x2   :  { %15 = vsyncpa [#allocation9], 0 }
   0x3   :  { %16 = vsyncpa [#allocation12], 0 }
   0x4   :  { %17 = vsyncpa [#allocation4], 0  ;;  %s1185_s27 = smov [#allocation5]   ;;  %s1186_s29 = smov [#allocation8]  }
   0x5   :  { %s34_s28 = sshll.u32 %s1185_s27, 4  ;;  %s53_s30 = sshll.u32 %s1186_s29, 4  ;;  %s35_s28 = int_to_ptr.vmem [resolvable:$true] %s34_s28  ;;  %s1249_s30 = int_to_ptr.vmem [resolvable:$true] %s53_s30 }
   0x6   :  { %s999_s11 = scalar_lea.hbm %s1445_s1, 128 }
   0x7   :  { %p1000_p0 = scmp.ne.s32.totalorder %s1445_s1, %s999_s11  ;;  %p1003_p1 = scmp.lt.u32.totalorder %s999_s11, %s1445_s1 }
   0x9   :  { %p1005_p2 = pnand %p1003_p1, %p1000_p0 }
   0xb   :  { %1008 = shalt.err (!%p1005_p2)
}
   0xc   :  { %s1009_s16 = scalar_lea.vmem %s35_s28, 128  ;;  %p1014_p4 = scmp.lt.s32.totalorder %s35_s28, %s35_s28 }
   0xd   :  { %p1010_p3 = scmp.ne.s32.totalorder %s35_s28, %s1009_s16  ;;  %p1015_p5 = scmp.lt.s32.totalorder %s1009_s16, %s1009_s16 }
   0xf   :  { %p1016_p6 = por %p1015_p5, %p1014_p4 }
  0x11   :  { %p1017_p7 = pnand %p1016_p6, %p1010_p3 }
  0x13   :  { %1020 = shalt.err (!%p1017_p7)
}
  0x14   :  { %37 = dma.hbm_to_vmem [thread:$0]  %s1445_s1, 128, %s35_s28, [#allocation6]  }
  0x15   :  { %s1021_s21 = scalar_lea.hbm %s1447_s3, 4096 }
  0x16   :  { %p1022_p8 = scmp.ne.s32.totalorder %s1447_s3, %s1021_s21  ;;  %p1025_p9 = scmp.lt.u32.totalorder %s1021_s21, %s1447_s3 }
  0x18   :  { %p1027_p10 = pnand %p1025_p9, %p1022_p8 }
  0x1a   :  { %1030 = shalt.err (!%p1027_p10)
}
  0x1b   :  { %s1031_s26 = scalar_lea.vmem %s1249_s30, 4096  ;;  %p1036_p12 = scmp.lt.s32.totalorder %s1249_s30, %s1249_s30 }
  0x1c   :  { %p1032_p11 = scmp.ne.s32.totalorder %s1249_s30, %s1031_s26  ;;  %p1037_p13 = scmp.lt.s32.totalorder %s1031_s26, %s1031_s26 }
  0x1e   :  { %p1038_p0 = por %p1037_p13, %p1036_p12 }
  0x20   :  { %p1039_p1 = pnand %p1038_p0, %p1032_p11 }
  0x22   :  { %1042 = shalt.err (!%p1039_p1)
}
  0x23   :  { %s1187_s1 = smov 512   ;;  %s1188_s27 = smov 32  }
  0x24   :  { %59 = dma.hbm_to_vmem [thread:$0]  %s1447_s3, 4096, %s1249_s30, [#allocation9], %s1187_s1, %s1187_s1, %s1188_s27  }
  0x25   :  { %s1189_s9 = smov [#allocation11]   ;;  %s1043_s13 = scalar_lea.hbm %s1450_s6, 512 }
  0x26   :  { %s79_s10 = sshll.u32 %s1189_s9, 4  ;;  %p1044_p2 = scmp.ne.s32.totalorder %s1450_s6, %s1043_s13  ;;  %s80_s10 = int_to_ptr.vmem [resolvable:$true] %s79_s10 }
  0x27   :  { %p1047_p3 = scmp.lt.u32.totalorder %s1043_s13, %s1450_s6 }
  0x29   :  { %p1049_p4 = pnand %p1047_p3, %p1044_p2 }
  0x2b   :  { %1052 = shalt.err (!%p1049_p4)
}
  0x2c   :  { %s1053_s18 = scalar_lea.vmem %s80_s10, 512  ;;  %p1058_p6 = scmp.lt.s32.totalorder %s80_s10, %s80_s10 }
  0x2d   :  { %p1054_p5 = scmp.ne.s32.totalorder %s80_s10, %s1053_s18  ;;  %p1059_p7 = scmp.lt.s32.totalorder %s1053_s18, %s1053_s18 }
  0x2f   :  { %p1060_p8 = por %p1059_p7, %p1058_p6 }
  0x31   :  { %p1061_p9 = pnand %p1060_p8, %p1054_p5 }
  0x33   :  { %1064 = shalt.err (!%p1061_p9)
}
  0x34   :  { %s1190_s3 = smov 128   ;;  %s1191_s30 = smov 8  }
  0x35   :  { %85 = dma.hbm_to_vmem [thread:$0]  %s1450_s6, 512, %s80_s10, [#allocation12], %s1190_s3, %s1190_s3, %s1191_s30  }
  0x36   :  { %s1192_s21 = smov [#allocation2]   ;;  %s1193_s23 = smov [#allocation7]  }
  0x37   :  { %s24_s22 = sshll.u32 %s1192_s21, 4  ;;  %s44_s24 = sshll.u32 %s1193_s23, 4  ;;  %s25_s22 = int_to_ptr.vmem [resolvable:$true] %s24_s22  ;;  %s45_s24 = int_to_ptr.vmem [resolvable:$true] %s44_s24 }
  0x38   :  { %s1065_s28 = scalar_lea.hbm %s1444_s0, 128 }
  0x39   :  { %p1066_p10 = scmp.ne.s32.totalorder %s1444_s0, %s1065_s28  ;;  %p1069_p11 = scmp.lt.u32.totalorder %s1065_s28, %s1444_s0 }
  0x3b   :  { %p1071_p12 = pnand %p1069_p11, %p1066_p10 }
  0x3d   :  { %1074 = shalt.err (!%p1071_p12)
}
  0x3e   :  { %s1075_s6 = scalar_lea.vmem %s25_s22, 128  ;;  %p1080_p0 = scmp.lt.s32.totalorder %s25_s22, %s25_s22 }
  0x3f   :  { %p1076_p13 = scmp.ne.s32.totalorder %s25_s22, %s1075_s6  ;;  %p1081_p1 = scmp.lt.s32.totalorder %s1075_s6, %s1075_s6 }
  0x41   :  { %p1082_p2 = por %p1081_p1, %p1080_p0 }
  0x43   :  { %p1083_p3 = pnand %p1082_p2, %p1076_p13 }
  0x45   :  { %1086 = shalt.err (!%p1083_p3)
}
  0x46   :  { %27 = dma.hbm_to_vmem [thread:$0]  %s1444_s0, 128, %s25_s22, [#allocation3]  }
  0x47   :  { %s1087_s16 = scalar_lea.hbm %s1446_s2, 128 }
  0x48   :  { %p1088_p4 = scmp.ne.s32.totalorder %s1446_s2, %s1087_s16  ;;  %p1091_p5 = scmp.lt.u32.totalorder %s1087_s16, %s1446_s2 }
  0x4a   :  { %p1093_p6 = pnand %p1091_p5, %p1088_p4 }
  0x4c   :  { %1096 = shalt.err (!%p1093_p6)
}
  0x4d   :  { %s1097_s19 = scalar_lea.vmem %s45_s24, 128  ;;  %p1102_p8 = scmp.lt.s32.totalorder %s45_s24, %s45_s24 }
  0x4e   :  { %p1098_p7 = scmp.ne.s32.totalorder %s45_s24, %s1097_s19  ;;  %p1103_p9 = scmp.lt.s32.totalorder %s1097_s19, %s1097_s19 }
  0x50   :  { %p1104_p10 = por %p1103_p9, %p1102_p8 }
  0x52   :  { %p1105_p11 = pnand %p1104_p10, %p1098_p7 }
  0x54   :  { %1108 = shalt.err (!%p1105_p11)
}
  0x55   :  { %47 = dma.hbm_to_vmem [thread:$0]  %s1446_s2, 128, %s45_s24, [#allocation6]  }
  0x56   :  { %s1194_s21 = smov [#allocation10]   ;;  %s1195_s23 = smov [#allocation13]  }
  0x57   :  { %s65_s22 = sshll.u32 %s1194_s21, 4  ;;  %s91_s25 = sshll.u32 %s1195_s23, 4  ;;  %s66_s22 = int_to_ptr.vmem [resolvable:$true] %s65_s22  ;;  %s92_s25 = int_to_ptr.vmem [resolvable:$true] %s91_s25 }
  0x58   :  { %s1109_s29 = scalar_lea.hbm %s1448_s4, 6144 }
  0x59   :  { %p1110_p12 = scmp.ne.s32.totalorder %s1448_s4, %s1109_s29  ;;  %p1113_p13 = scmp.lt.u32.totalorder %s1109_s29, %s1448_s4 }
  0x5b   :  { %p1115_p0 = pnand %p1113_p13, %p1110_p12 }
  0x5d   :  { %1118 = shalt.err (!%p1115_p0)
}
  0x5e   :  { %s1119_s2 = scalar_lea.vmem %s66_s22, 6144  ;;  %p1124_p2 = scmp.lt.s32.totalorder %s66_s22, %s66_s22 }
  0x5f   :  { %p1120_p1 = scmp.ne.s32.totalorder %s66_s22, %s1119_s2  ;;  %p1125_p3 = scmp.lt.s32.totalorder %s1119_s2, %s1119_s2 }
  0x61   :  { %p1126_p4 = por %p1125_p3, %p1124_p2 }
  0x63   :  { %p1127_p5 = pnand %p1126_p4, %p1120_p1 }
  0x65   :  { %1130 = shalt.err (!%p1127_p5)
}
  0x66   :  { %71 = dma.hbm_to_vmem [thread:$0]  %s1448_s4, 6144, %s66_s22, [#allocation9], %s1187_s1, %s1187_s1, %s1188_s27  }
  0x67   :  { %s1131_s15 = scalar_lea.hbm %s1451_s7, 1024 }
  0x68   :  { %p1132_p6 = scmp.ne.s32.totalorder %s1451_s7, %s1131_s15  ;;  %p1135_p7 = scmp.lt.u32.totalorder %s1131_s15, %s1451_s7 }
  0x6a   :  { %p1137_p8 = pnand %p1135_p7, %p1132_p6 }
  0x6c   :  { %1140 = shalt.err (!%p1137_p8)
}
  0x6d   :  { %s1141_s30 = scalar_lea.vmem %s92_s25, 1024  ;;  %p1146_p10 = scmp.lt.s32.totalorder %s92_s25, %s92_s25 }
  0x6e   :  { %p1142_p9 = scmp.ne.s32.totalorder %s92_s25, %s1141_s30  ;;  %p1147_p11 = scmp.lt.s32.totalorder %s1141_s30, %s1141_s30 }
  0x70   :  { %p1148_p12 = por %p1147_p11, %p1146_p10 }
  0x72   :  { %p1149_p13 = pnand %p1148_p12, %p1142_p9 }
  0x74   :  { %1152 = shalt.err (!%p1149_p13)
}
  0x75   :  { %s1196_s4 = smov 256   ;;  %s1197_s1 = smov 16  }
  0x76   :  { %97 = dma.hbm_to_vmem [thread:$0]  %s1451_s7, 1024, %s92_s25, [#allocation12], %s1196_s4, %s1196_s4, %s1197_s1  }
  0x77   :  { %1175 = dma.done.wait [#allocation3], 128  }
  0x78   :  { %1176 = vsyncadd [#allocation3], 4294967168 }
  0x79   :  { %1177 = dma.done.wait [#allocation6], 256  }
  0x7a   :  { %1178 = vsyncadd [#allocation6], 4294967040 }
  0x7b   :  { %1179 = dma.done.wait [#allocation9], 10240  }
  0x7c   :  { %1180 = vsyncadd [#allocation9], 4294957056 }
  0x7d   :  { %1181 = dma.done.wait [#allocation12], 1536  }
  0x7e   :  { %1182 = vsyncadd [#allocation12], 4294965760  ;;  %v1198_v0 = vmov 0.0   ;;  %v155_v1 = vld [vmem:[#allocation10 + $0x8] sm:$0xff]  ;;  %v154_v3 = vld [vmem:[#allocation10] sm:$0xff]  ;;  %vm202_vm0 = vcmask 785408   ;;  %v496_v63 = vlaneseq }
  0x7f   :  { %270 = vmatprep.mubr.f32.mxu0 %v1198_v0  ;;  %341 = vmatprep.mubr.f32.mxu1 %v1198_v0  ;;  %v159_v2 = vld [vmem:[#allocation10 + $0x28] sm:$0xff]  ;;  %v158_v5 = vld [vmem:[#allocation10 + $0x20] sm:$0xff]  ;;  %v1348_v44 = vld [vmem:[#allocation5] sm:$0xff]  ;;  %vm348_vm1 = vcmask 523264   ;;  %s1199_s21 = smov 64   ;;  %vm1201_vm2 = vmmov 0  }
  0x80   :  { %v850_v4 = vpack.c.bf16 %v159_v2, %v155_v1  ;;  %v163_v6 = vld [vmem:[#allocation10 + $0x48] sm:$0xff]  ;;  %v852_v8 = vpack.c.bf16 %v158_v5, %v154_v3  ;;  %v162_v10 = vld [vmem:[#allocation10 + $0x40] sm:$0xff]  ;;  %v1357_v1 = vshrl.u32 %v496_v63, 7  ;;  %vm555_vm3 = vcmask 261120  }
  0x81   :  { %v167_v7 = vld [vmem:[#allocation10 + $0x68] sm:$0xff]  ;;  %v166_v11 = vld [vmem:[#allocation10 + $0x60] sm:$0xff] }
  0x82   :  { %v854_v9 = vpack.c.bf16 %v167_v7, %v163_v6  ;;  %v171_v12 = vld [vmem:[#allocation10 + $0x88] sm:$0xff]  ;;  %851 = vmatprep.subr.bf16.mxu0 %v850_v4  ;;  %v856_v14 = vpack.c.bf16 %v166_v11, %v162_v10  ;;  %v170_v16 = vld [vmem:[#allocation10 + $0x80] sm:$0xff]  ;;  %v498_v2 = vsub.s32 0, %v1357_v1 }
  0x83   :  { %v175_v13 = vld [vmem:[#allocation10 + $0xa8] sm:$0xff]  ;;  %853 = vmatpush1.bf16.msra.mxu0 %v852_v8  ;;  %v174_v17 = vld [vmem:[#allocation10 + $0xa0] sm:$0xff] }
  0x84   :  { %855 = vmatprep.subr.bf16.mxu0 %v854_v9  ;;  %v858_v15 = vpack.c.bf16 %v175_v13, %v171_v12  ;;  %v179_v18 = vld [vmem:[#allocation10 + $0xc8] sm:$0xff]  ;;  %v860_v20 = vpack.c.bf16 %v174_v17, %v170_v16  ;;  %v178_v22 = vld [vmem:[#allocation10 + $0xc0] sm:$0xff]  ;;  %v1367_v9 = vld [vmem:[#allocation7] sm:$0xff] }
  0x85   :  { %v183_v19 = vld [vmem:[#allocation10 + $0xe8] sm:$0xff]  ;;  %v182_v23 = vld [vmem:[#allocation10 + $0xe0] sm:$0xff] }
  0x86   :  { %v862_v21 = vpack.c.bf16 %v183_v19, %v179_v18  ;;  %v187_v24 = vld [vmem:[#allocation10 + $0x108] sm:$0xff]  ;;  %v864_v26 = vpack.c.bf16 %v182_v23, %v178_v22  ;;  %v186_v28 = vld [vmem:[#allocation10 + $0x100] sm:$0xff]  ;;  %v550_v22 = vld [vmem:[#allocation11 + $0x10] sm:$0xff]  ;;  %v1200_v23 = vmov 0.0|0.0  }
  0x87   :  { %857 = vmatpush1.bf16.msra.mxu0 %v856_v14  ;;  %v191_v25 = vld [vmem:[#allocation10 + $0x128] sm:$0xff]  ;;  %v190_v29 = vld [vmem:[#allocation10 + $0x120] sm:$0xff] }
  0x88   :  { %859 = vmatprep.subr.bf16.mxu0 %v858_v15  ;;  %v866_v27 = vpack.c.bf16 %v191_v25, %v187_v24  ;;  %v195_v30 = vld [vmem:[#allocation10 + $0x148] sm:$0xff]  ;;  %v868_v32 = vpack.c.bf16 %v190_v29, %v186_v28  ;;  %v194_v34 = vld [vmem:[#allocation10 + $0x140] sm:$0xff]  ;;  %v551_v25 = vld [vmem:[#allocation11 + $0x18] sm:$0xff] }
  0x89   :  { %v199_v31 = vld [vmem:[#allocation10 + $0x168] sm:$0xff]  ;;  %v198_v35 = vld [vmem:[#allocation10 + $0x160] sm:$0xff] }
  0x8a   :  { %v870_v33 = vpack.c.bf16 %v199_v31, %v195_v30  ;;  %v123_v36 = vld [vmem:[#allocation8 + $0x8] sm:$0xff]  ;;  %v872_v38 = vpack.c.bf16 %v198_v35, %v194_v34  ;;  %v122_v40 = vld [vmem:[#allocation8] sm:$0xff]  ;;  %v502_v31 = vsub.s32 1, %v1357_v1 }
  0x8b   :  { %861 = vmatpush1.bf16.msra.mxu0 %v860_v20  ;;  %v127_v37 = vld [vmem:[#allocation8 + $0x28] sm:$0xff]  ;;  %v126_v41 = vld [vmem:[#allocation8 + $0x20] sm:$0xff] }
  0x8c   :  { %863 = vmatprep.subr.bf16.mxu0 %v862_v21  ;;  %v898_v39 = vpack.c.bf16 %v127_v37, %v123_v36  ;;  %v131_v42 = vld [vmem:[#allocation8 + $0x48] sm:$0xff]  ;;  %v900_v45 = vpack.c.bf16 %v126_v41, %v122_v40  ;;  %v130_v47 = vld [vmem:[#allocation8 + $0x40] sm:$0xff] }
  0x8d   :  { %v135_v43 = vld [vmem:[#allocation8 + $0x68] sm:$0xff]  ;;  %v134_v48 = vld [vmem:[#allocation8 + $0x60] sm:$0xff] }
  0x8e   :  { %v902_v46 = vpack.c.bf16 %v135_v43, %v131_v42  ;;  %v139_v49 = vld [vmem:[#allocation8 + $0x88] sm:$0xff]  ;;  %v904_v51 = vpack.c.bf16 %v134_v48, %v130_v47  ;;  %v138_v53 = vld [vmem:[#allocation8 + $0x80] sm:$0xff]  ;;  %v157_v48 = vld [vmem:[#allocation10 + $0x18] sm:$0xff] }
  0x8f   :  { %865 = vmatpush1.bf16.msra.mxu0 %v864_v26  ;;  %v143_v50 = vld [vmem:[#allocation8 + $0xa8] sm:$0xff]  ;;  %v142_v54 = vld [vmem:[#allocation8 + $0xa0] sm:$0xff]  ;;  %v934_v26 = vpack.c.bf16 %v551_v25, %v550_v22  ;;  %v200_v25 = vld [vmem:[#allocation10 + $0x170] sm:$0xff] }
  0x90   :  { %867 = vmatprep.subr.bf16.mxu0 %v866_v27  ;;  %v906_v52 = vpack.c.bf16 %v143_v50, %v139_v49  ;;  %v147_v55 = vld [vmem:[#allocation8 + $0xc8] sm:$0xff]  ;;  %v908_v57 = vpack.c.bf16 %v142_v54, %v138_v53  ;;  %v146_v59 = vld [vmem:[#allocation8 + $0xc0] sm:$0xff]  ;;  %v161_v49 = vld [vmem:[#allocation10 + $0x38] sm:$0xff] }
  0x91   :  { %v151_v56 = vld [vmem:[#allocation8 + $0xe8] sm:$0xff]  ;;  %v150_v60 = vld [vmem:[#allocation8 + $0xe0] sm:$0xff]  ;;  %v156_v50 = vld [vmem:[#allocation10 + $0x10] sm:$0xff] }
  0x92   :  { %v910_v58 = vpack.c.bf16 %v151_v56, %v147_v55  ;;  %v912_v61 = vpack.c.bf16 %v150_v60, %v146_v59  ;;  %v1353_v62 = vld [vmem:[#allocation2] sm:$0xff]  ;;  %v548_v20 = vld [vmem:[#allocation11] sm:$0xff]  ;;  %v165_v53 = vld [vmem:[#allocation10 + $0x58] sm:$0xff] }
  0x93   :  { %869 = vmatpush1.bf16.msra.mxu0 %v868_v32  ;;  %v1363_v3 = vld [vmem:[%s1449_s5] sm:$0xf]  ;;  %v169_v54 = vld [vmem:[#allocation10 + $0x78] sm:$0xff]  ;;  %s1202_s5 = smov 96  }
  0x94   :  { %871 = vmatprep.subr.bf16.mxu0 %v870_v33  ;;  %v499_v4 = vrot.slane %v1363_v3, %v498_v2  ;;  %v549_v21 = vld [vmem:[#allocation11 + $0x8] sm:$0xff]  ;;  %v503_v32 = vrot.slane %v1363_v3, %v502_v31  ;;  %v878_v56 = vpack.c.bf16 %v169_v54, %v165_v53  ;;  %v173_v59 = vld [vmem:[#allocation10 + $0x98] sm:$0xff]  ;;  %v172_v2 = vld [vmem:[#allocation10 + $0x90] sm:$0xff] }
  0x95   :  { %v931_v24 = vpack.c.bf16 %v549_v21, %v548_v20  ;;  %v177_v60 = vld [vmem:[#allocation10 + $0xb8] sm:$0xff]  ;;  %v148_v53 = vld [vmem:[#allocation8 + $0xd0] sm:$0xff] }
  0x96   :  { %v882_v63 = vpack.c.bf16 %v177_v60, %v173_v59  ;;  %v197_v20 = vld [vmem:[#allocation10 + $0x158] sm:$0xff]  ;;  %v152_v54 = vld [vmem:[#allocation8 + $0xf0] sm:$0xff]  ;;  %v659_v60 = vld [vmem:[#allocation13 + $0x28] sm:$0xff] }
  0x97   :  { %873 = vmatpush1.bf16.msra.mxu0 %v872_v38  ;;  %v201_v21 = vld [vmem:[#allocation10 + $0x178] sm:$0xff]  ;;  %v656_v59 = vld [vmem:[#allocation13 + $0x10] sm:$0xff] }
  0x98   :  { %899 = vmatprep.subr.bf16.mxu0 %v898_v39 }
  0x9a   :  { %824 = vmatmul.mubr.msk.f32.vlgmr.msra.gmra.mrb[0].mxu0 %vm202_vm0, %v1348_v44 }
  0x9b   :  { %901 = vmatpush1.bf16.msra.mxu0 %v900_v45  ;;  %416 = vmatprep.mubr.f32.mxu0 %v1198_v0 }
  0x9c   :  { %903 = vmatprep.subr.bf16.mxu0 %v902_v46 }
  0x9f   :  { %905 = vmatpush1.bf16.msra.mxu0 %v904_v51  ;;  %v874_v51 = vpack.c.bf16 %v161_v49, %v157_v48  ;;  %v144_v48 = vld [vmem:[#allocation8 + $0xb0] sm:$0xff]  ;;  %v149_v49 = vld [vmem:[#allocation8 + $0xd8] sm:$0xff] }
  0xa0   :  { %907 = vmatprep.subr.bf16.mxu0 %v906_v52  ;;  %v160_v52 = vld [vmem:[#allocation10 + $0x30] sm:$0xff] }
  0xa1   :  { %v876_v55 = vpack.c.bf16 %v160_v52, %v156_v50  ;;  %875 = vmatprep.subr.bf16.mxu1 %v874_v51  ;;  %v153_v50 = vld [vmem:[#allocation8 + $0xf8] sm:$0xff] }
  0xa2   :  { %v926_v52 = vpack.c.bf16 %v153_v50, %v149_v49 }
  0xa3   :  { %909 = vmatpush1.bf16.msra.mxu0 %v908_v57  ;;  %v164_v57 = vld [vmem:[#allocation10 + $0x50] sm:$0xff]  ;;  %877 = vmatpush1.bf16.msra.mxu1 %v876_v55  ;;  %v655_v55 = vld [vmem:[#allocation13 + $0x8] sm:$0xff] }
  0xa4   :  { %911 = vmatprep.subr.bf16.mxu0 %v910_v58  ;;  %v168_v58 = vld [vmem:[#allocation10 + $0x70] sm:$0xff]  ;;  %879 = vmatprep.subr.bf16.mxu1 %v878_v56  ;;  %v657_v56 = vld [vmem:[#allocation13 + $0x18] sm:$0xff] }
  0xa7   :  { %913 = vmatpush1.bf16.msra.mxu0 %v912_v61  ;;  %v880_v61 = vpack.c.bf16 %v168_v58, %v164_v57  ;;  %v936_v57 = vpack.c.bf16 %v657_v56, %v655_v55  ;;  %v654_v58 = vld [vmem:[#allocation13] sm:$0xff] }
  0xa8   :  { %930 = vmatprep.subr.bf16.mxu0 %v1200_v23 }
  0xa9   :  { %881 = vmatpush1.bf16.msra.mxu1 %v880_v61  ;;  %v661_v61 = vld [vmem:[#allocation13 + $0x38] sm:$0xff] }
  0xaa   :  { %826 = vmatmul.mubr.msk.f32.vlgmr.msra.gmra.mrb[0].mxu0 %vm348_vm1, %v1353_v62  ;;  %883 = vmatprep.subr.bf16.mxu1 %v882_v63  ;;  %v938_v63 = vpack.c.bf16 %v656_v59, %v654_v58 }
  0xab   :  { %847 = vmatprep.mubr.msk.f32.mxu0 %vm1201_vm2, %v1198_v0  ;;  %932 = vmatpush3.bf16.msra.mxu0 %v931_v24  ;;  %v196_v24 = vld [vmem:[#allocation10 + $0x150] sm:$0xff] }
  0xac   :  { %933 = vmatprep.subr.bf16.mxu0 %v1200_v23  ;;  %v894_v23 = vpack.c.bf16 %v201_v21, %v197_v20 }
  0xaf   :  { %935 = vmatpush3.bf16.msra.mxu0 %v934_v26  ;;  %v125_v26 = vld [vmem:[#allocation8 + $0x18] sm:$0xff] }
 0x17d   :  { %v418_v5 = vpop.f32.mrb[0].mxu0 }
 0x17e   :  { %v516_v6 = vadd.f32 %v499_v4, %v418_v5  ;;  %v420_v7 = vpop.f32.mrb[1].mxu0  ;;  %v176_v4 = vld [vmem:[#allocation10 + $0xb0] sm:$0xff]  ;;  %v181_v5 = vld [vmem:[#allocation10 + $0xd8] sm:$0xff] }
 0x17f   :  { %v517_v33 = vadd.f32 %v503_v32, %v420_v7  ;;  %v124_v32 = vld [vmem:[#allocation8 + $0x10] sm:$0xff] }
 0x180   :  { %971 = vtanh.f32 %v516_v6  ;;  %v828_v10 = vmul.f32 -1.442695, %v516_v6  ;;  %v185_v6 = vld [vmem:[#allocation10 + $0xf8] sm:$0xff] }
 0x182   :  { %973 = vpow2.f32 %v828_v10  ;;  %v886_v10 = vpack.c.bf16 %v185_v6, %v181_v5  ;;  %v660_v5 = vld [vmem:[#allocation13 + $0x30] sm:$0xff] }
 0x18a   :  { %v972_v8 = vpop.eup %971 }
 0x18b   :  { %533 = vrot.lane.b32.xlu0 %v972_v8, %s1199_s21  ;;  %v884_v8 = vpack.c.bf16 %v176_v4, %v172_v2  ;;  %v940_v2 = vpack.c.bf16 %v661_v61, %v659_v60  ;;  %v658_v4 = vld [vmem:[#allocation13 + $0x20] sm:$0xff] }
 0x18c   :  { %v974_v11 = vpop.eup %973  ;;  %v942_v6 = vpack.c.bf16 %v660_v5, %v658_v4 }
 0x18d   :  { %v523_v12 = vadd.f32 1.0, %v974_v11  ;;  %v180_v11 = vld [vmem:[#allocation10 + $0xd0] sm:$0xff]  ;;  %885 = vmatpush1.bf16.msra.mxu1 %v884_v8 }
 0x18e   :  { %887 = vmatprep.subr.bf16.mxu1 %v886_v10 }
 0x18f   :  { %528 = vrot.lane.b32.xlu0 %v1367_v9, %s1188_s27  ;;  %975 = vrcp.f32 %v523_v12  ;;  %v184_v12 = vld [vmem:[#allocation10 + $0xf0] sm:$0xff] }
 0x199   :  { %v976_v13 = vpop.eup %975 }
 0x1fd   :  { %v534_v14 = vpop.permute.xlu0 %533 }
 0x1fe   :  { %v536_v15 = vmul.f32 %v976_v13, %v534_v14  ;;  %v193_v14 = vld [vmem:[#allocation10 + $0x138] sm:$0xff] }
 0x200   :  { %538 = vrot.lane.b32.xlu1 %v536_v15, %s1188_s27  ;;  %v888_v15 = vpack.c.bf16 %v184_v12, %v180_v11 }
 0x201   :  { %v529_v16 = vpop.permute.xlu0 %528 }
 0x202   :  { %v531_v17 = vmul.f32 %v976_v13, %v529_v16  ;;  %889 = vmatpush1.bf16.msra.mxu1 %v888_v15 }
 0x272   :  { %v539_v18 = vpop.permute.xlu1 %538 }
 0x273   :  { %v1372_v19 = vadd.f32 %v539_v18, %v531_v17  ;;  %v188_v17 = vld [vmem:[#allocation10 + $0x110] sm:$0xff] }
 0x274   :  { %v192_v18 = vld [vmem:[#allocation10 + $0x130] sm:$0xff] }
 0x275   :  { %977 = vtanh.f32 %v1372_v19  ;;  %v892_v22 = vpack.c.bf16 %v192_v18, %v188_v17 }
 0x27f   :  { %v978_v27 = vpop.eup %977 }
 0x280   :  { %544 = vrot.lane.b32.xlu1 %v978_v27, %s1199_s21  ;;  %v129_v27 = vld [vmem:[#allocation8 + $0x38] sm:$0xff] }
 0x281   :  { %v914_v31 = vpack.c.bf16 %v129_v27, %v125_v26 }
 0x2f2   :  { %v545_v28 = vpop.permute.xlu1 %544 }
 0x2f3   :  { %v1377_v29 = vmul.f32 %v976_v13, %v545_v28  ;;  %v189_v13 = vld [vmem:[#allocation10 + $0x118] sm:$0xff]  ;;  %v896_v28 = vpack.c.bf16 %v200_v25, %v196_v24  ;;  %v510_v25 = vsub.s32 3, %v1357_v1 }
 0x2f4   :  { %v890_v16 = vpack.c.bf16 %v193_v14, %v189_v13 }
 0x2f5   :  { %553 = vrot.lane.b32.xlu0 %v1377_v29, %s1188_s27  ;;  %v511_v26 = vrot.slane %v1363_v3, %v510_v25 }
 0x2f6   :  { %891 = vmatprep.subr.bf16.mxu1 %v890_v16 }
 0x2f7   :  { %893 = vmatpush1.bf16.msra.mxu1 %v892_v22 }
 0x2f8   :  { %895 = vmatprep.subr.bf16.mxu1 %v894_v23 }
 0x2fb   :  { %897 = vmatpush1.bf16.msra.mxu1 %v896_v28 }
 0x2fc   :  { %915 = vmatprep.subr.bf16.mxu1 %v914_v31 }
 0x2fe   :  { %825 = vmatmul.mubr.msk.f32.vlgmr.msra.gmra.mrb[0].mxu1 %vm202_vm0, %v1348_v44  ;;  %v928_v44 = vpack.c.bf16 %v152_v54, %v148_v53 }
 0x2ff   :  { %487 = vmatprep.mubr.f32.mxu1 %v1198_v0 }
 0x367   :  { %v1381_v30 = vpop.permute.xlu0 %553 }
 0x368   :  { %848 = vmatmul.mubr.msk.f32.vlgmr.msra.gmra.mrb[2].mxu0 %vm555_vm3, %v1381_v30 }
 0x43b   :  { %v624_v34 = vpop.f32.mrb[2].mxu0 }
 0x43c   :  { %v628_v35 = vadd.f32 %v624_v34, %v517_v33  ;;  %v849_v36 = vpop.f32.mrb[3].mxu0  ;;  %v128_v33 = vld [vmem:[#allocation8 + $0x30] sm:$0xff]  ;;  %v133_v34 = vld [vmem:[#allocation8 + $0x58] sm:$0xff] }
 0x43d   :  { %v916_v36 = vpack.c.bf16 %v128_v33, %v124_v32 }
 0x43e   :  { %979 = vtanh.f32 %v628_v35  ;;  %v830_v38 = vmul.f32 -1.442695, %v628_v35  ;;  %v137_v35 = vld [vmem:[#allocation8 + $0x78] sm:$0xff] }
 0x43f   :  { %917 = vmatpush1.bf16.msra.mxu1 %v916_v36 }
 0x440   :  { %981 = vpow2.f32 %v830_v38  ;;  %v132_v38 = vld [vmem:[#allocation8 + $0x50] sm:$0xff] }
 0x448   :  { %v980_v37 = vpop.eup %979 }
 0x449   :  { %638 = vrot.lane.b32.xlu1 %v980_v37, %s1199_s21  ;;  %v918_v37 = vpack.c.bf16 %v137_v35, %v133_v34 }
 0x44a   :  { %v982_v39 = vpop.eup %981 }
 0x44b   :  { %v632_v40 = vadd.f32 1.0, %v982_v39  ;;  %v136_v39 = vld [vmem:[#allocation8 + $0x70] sm:$0xff]  ;;  %919 = vmatprep.subr.bf16.mxu1 %v918_v37 }
 0x44d   :  { %983 = vrcp.f32 %v632_v40  ;;  %v141_v40 = vld [vmem:[#allocation8 + $0x98] sm:$0xff] }
 0x457   :  { %v1388_v41 = vpop.eup %983 }
 0x458   :  { %v636_v45 = vmul.f32 %v1388_v41, %v1367_v9 }
 0x4bb   :  { %v639_v42 = vpop.permute.xlu1 %638 }
 0x4bc   :  { %v641_v43 = vmul.f32 %v1388_v41, %v639_v42  ;;  %v145_v42 = vld [vmem:[#allocation8 + $0xb8] sm:$0xff] }
 0x4be   :  { %643 = vrot.lane.b32.xlu0 %v641_v43, %s1188_s27  ;;  %v920_v43 = vpack.c.bf16 %v136_v39, %v132_v38 }
 0x4c0   :  { %921 = vmatpush1.bf16.msra.mxu1 %v920_v43 }
 0x530   :  { %v644_v46 = vpop.permute.xlu0 %643 }
 0x531   :  { %v1394_v47 = vadd.f32 %v644_v46, %v636_v45  ;;  %v922_v45 = vpack.c.bf16 %v145_v42, %v141_v40  ;;  %v140_v46 = vld [vmem:[#allocation8 + $0x90] sm:$0xff] }
 0x532   :  { %v924_v51 = vpack.c.bf16 %v144_v48, %v140_v46 }
 0x533   :  { %985 = vtanh.f32 %v1394_v47  ;;  %923 = vmatprep.subr.bf16.mxu1 %v922_v45 }
 0x534   :  { %925 = vmatpush1.bf16.msra.mxu1 %v924_v51 }
 0x535   :  { %927 = vmatprep.subr.bf16.mxu1 %v926_v52 }
 0x538   :  { %929 = vmatpush1.bf16.msra.mxu1 %v928_v44 }
 0x539   :  { %937 = vmatprep.subr.bf16.mxu1 %v936_v57 }
 0x53b   :  { %827 = vmatmul.mubr.msk.f32.vlgmr.msra.gmra.mrb[0].mxu1 %vm348_vm1, %v1353_v62  ;;  %v506_v62 = vsub.s32 2, %v1357_v1 }
 0x53c   :  { %939 = vmatpush1.bf16.msra.mxu1 %v938_v63  ;;  %731 = vmatprep.mubr.f32.mxu1 %v1198_v0 }
 0x53d   :  { %v986_v7 = vpop.eup %985  ;;  %941 = vmatprep.subr.bf16.mxu1 %v940_v2  ;;  %v507_v0 = vrot.slane %v1363_v3, %v506_v62 }
 0x53e   :  { %649 = vrot.lane.b32.xlu1 %v986_v7, %s1199_s21 }
 0x540   :  { %943 = vmatpush1.bf16.msra.mxu1 %v942_v6 }
 0x5b0   :  { %v650_v7 = vpop.permute.xlu1 %649 }
 0x5b1   :  { %v652_v8 = vmul.f32 %v1388_v41, %v650_v7 }
 0x5b3   :  { %v653_v10 = vadd.f32 %v652_v8, %v1377_v29 }
 0x5b5   :  { %663 = vrot.lane.b32.xlu0 %v653_v10, %s1188_s27 }
 0x5b9   :  { %753 = vrot.lane.b32.xlu0 %v1367_v9, %s1202_s5 }
 0x627   :  { %v664_v11 = vpop.permute.xlu0 %663 }
 0x628   :  { %831 = vmatmul.mubr.msk.f32.vlgmr.msra.gmra.mrb[0].mxu1 %vm555_vm3, %v664_v11 }
 0x62b   :  { %v754_v20 = vpop.permute.xlu0 %753 }
 0x6fb   :  { %v733_v12 = vpop.f32.mrb[0].mxu1 }
 0x6fc   :  { %v944_v13 = vadd.f32 %v733_v12, %v507_v0  ;;  %v735_v14 = vpop.f32.mrb[1].mxu1 }
 0x6fd   :  { %v945_v27 = vadd.f32 %v735_v14, %v511_v26 }
 0x6fe   :  { %987 = vtanh.f32 %v944_v13  ;;  %v832_v29 = vmul.f32 -1.442695, %v944_v13 }
 0x6ff   :  { %v833_v28 = vmul.f32 -1.442695, %v945_v27 }
 0x700   :  { %989 = vpow2.f32 %v832_v29 }
 0x708   :  { %v988_v41 = vpop.eup %987 }
 0x709   :  { %758 = vrot.lane.b32.xlu1 %v988_v41, %s1199_s21 }
 0x70a   :  { %v990_v15 = vpop.eup %989 }
 0x70b   :  { %v746_v16 = vadd.f32 1.0, %v990_v15 }
 0x70d   :  { %991 = vrcp.f32 %v746_v16 }
 0x717   :  { %v992_v9 = vpop.eup %991 }
 0x718   :  { %v756_v21 = vmul.f32 %v992_v9, %v754_v20 }
 0x77b   :  { %v759_v17 = vpop.permute.xlu1 %758 }
 0x77c   :  { %v761_v18 = vmul.f32 %v992_v9, %v759_v17 }
 0x77e   :  { %763 = vrot.lane.b32.xlu1 %v761_v18, %s1188_s27  ;;  %s1203_s27 = smov [#allocation14]  }
 0x77f   :  { %s812_s22 = sshll.u32 %s1203_s27, 4  ;;  %s813_s22 = int_to_ptr.vmem [resolvable:$true] %s812_s22 }
 0x780   :  { %s1153_s23 = scalar_lea.vmem %s813_s22, 256  ;;  %p1158_p1 = scmp.lt.s32.totalorder %s813_s22, %s813_s22 }
 0x781   :  { %p1154_p0 = scmp.ne.s32.totalorder %s813_s22, %s1153_s23  ;;  %p1159_p2 = scmp.lt.s32.totalorder %s1153_s23, %s1153_s23 }
 0x783   :  { %p1160_p3 = por %p1159_p2, %p1158_p1 }
 0x785   :  { %p1161_p4 = pnand %p1160_p3, %p1154_p0 }
 0x7f0   :  { %v764_v22 = vpop.permute.xlu1 %763 }
 0x7f1   :  { %v766_v23 = vadd.f32 %v764_v22, %v756_v21 }
 0x7f3   :  { %993 = vtanh.f32 %v766_v23 }
 0x7f4   :  { %995 = vpow2.f32 %v833_v28 }
 0x7fd   :  { %v994_v24 = vpop.eup %993 }
 0x7fe   :  { %773 = vrot.lane.b32.xlu1 %v994_v24, %s1202_s5  ;;  %769 = vrot.lane.b32.xlu0 %v994_v24, %s1199_s21  ;;  %v996_v31 = vpop.eup %995 }
 0x7ff   :  { %v747_v32 = vadd.f32 1.0, %v996_v31 }
 0x801   :  { %997 = vrcp.f32 %v747_v32 }
 0x802   :  { %791 = vrot.lane.b32.xlu1 %v1394_v47, %s1202_s5  ;;  %779 = vrot.lane.b32.xlu0 %v652_v8, %s1199_s21 }
 0x80b   :  { %v998_v33 = vpop.eup %997 }
 0x870   :  { %v774_v34 = vpop.permute.xlu1 %773  ;;  %v770_v35 = vpop.permute.xlu0 %769 }
 0x871   :  { %v776_v36 = vmul.f32 %v998_v33, %v774_v34  ;;  %v772_v37 = vmul.f32 %v992_v9, %v770_v35 }
 0x873   :  { %795 = vrot.lane.b32.xlu1 %v776_v36, %s1199_s21  ;;  %783 = vrot.lane.b32.xlu0 %v772_v37, %s1202_s5 }
 0x874   :  { %v792_v1 = vpop.permute.xlu1 %791  ;;  %v780_v3 = vpop.permute.xlu0 %779 }
 0x875   :  { %v801_v47 = vsel %vm555_vm3, %v792_v1, %v766_v23  ;;  %v798_v43 = vsel %vm555_vm3, %v1381_v30, %v780_v3 }
 0x877   :  { %787 = vrot.lane.b32.xlu0 %v1372_v19, %s1199_s21 }
 0x8e5   :  { %v796_v38 = vpop.permute.xlu1 %795  ;;  %v784_v39 = vpop.permute.xlu0 %783 }
 0x8e6   :  { %v802_v40 = vsel %vm348_vm1, %v801_v47, %v796_v38  ;;  %v799_v45 = vsel %vm348_vm1, %v798_v43, %v784_v39 }
 0x8e7   :  { %v803_v42 = vsel %vm202_vm0, %v802_v40, 0.0 }
 0x8e8   :  { %805 = vst [vmem:[#allocation14 + $0x8] sm:$0xff] %v803_v42 }
 0x8e9   :  { %v788_v46 = vpop.permute.xlu0 %787 }
 0x8ea   :  { %v800_v19 = vsel %vm202_vm0, %v799_v45, %v788_v46 }
 0x8eb   :  { %804 = vst [vmem:[#allocation14] sm:$0xff] %v800_v19 }
 0x8ec   :  { %1164 = shalt.err (!%p1161_p4)
}
 0x8ed   :  { %s1165_s28 = scalar_lea.hbm %s1452_s8, 256 }
 0x8ee   :  { %p1166_p5 = scmp.ne.s32.totalorder %s1452_s8, %s1165_s28  ;;  %p1169_p6 = scmp.lt.u32.totalorder %s1165_s28, %s1452_s8 }
 0x8f0   :  { %p1171_p7 = pnand %p1169_p6, %p1166_p5 }
 0x8f2   :  { %1174 = shalt.err (!%p1171_p7)
}
 0x8f3   :  { %815 = dma.vmem_to_hbm [thread:$0]  %s813_s22, 256, %s1452_s8, [#allocation4]  }
 0x8f4   :  { %1183 = dma.done.wait [#allocation4], 256  }
 0x8f5   :  { %1184 = vsyncadd [#allocation4], 4294967040 }
 0x8f6   :  { %819 = vsyncpa [#allocation3], 1 }
 0x8f7   :  { %820 = vsyncpa [#allocation6], 1 }
 0x8f8   :  { %821 = vsyncpa [#allocation9], 1 }
 0x8f9   :  { %822 = vsyncpa [#allocation12], 1 }
 0x8fa   :  { %823 = vsyncpa [#allocation4], 1 }

</bundles_post_ra>
